<compile_context>
chip_gen: v6e
topology: v6e:2x2x1
jax: 0.10.0
libtpu: 0.0.40
codegen_flags: <defaults>
</compile_context>

<pallas_src>
import functools

import jax
import jax.numpy as jnp
from jax.experimental import pallas as pl
from jax.experimental.pallas import tpu as pltpu

LANE = 128     # TPU lane width  (last dim)
SUBLANE = 8    # TPU sublane width (second-to-last dim)

IN_FEATURES = 10
OUT_FEATURES = 10


def _round_up(n, m):
    return (n + m - 1) // m * m


def linear_kernel(x_ref, w_ref, b_ref, o_ref):
    # x: (TB, K_pad)   -- activations (lane-dense)
    # w: (K_pad, N_pad) -- already W^T (in, out); no in-kernel transpose
    # b: (1, N_pad)     -- broadcast bias add (stride-0 sublane broadcast)
    y = jnp.dot(x_ref[...], w_ref[...], preferred_element_type=jnp.float32)
    o_ref[...] = (y + b_ref[...]).astype(o_ref.dtype)


def prepare_params(weight, bias):
    """One-time parameter prep: transpose PyTorch-style (out, in) weight to
    (in, out) and zero-pad both weight and bias to the 128-lane width."""
    k_pad = _round_up(IN_FEATURES, LANE)
    n_pad = _round_up(OUT_FEATURES, LANE)
    w_t = weight.T  # (in, out)
    w_t_pad = (
        jnp.zeros((k_pad, n_pad), weight.dtype)
        .at[:IN_FEATURES, :OUT_FEATURES]
        .set(w_t)
    )
    b_pad = jnp.zeros((1, n_pad), bias.dtype).at[0, :OUT_FEATURES].set(bias)
    return w_t_pad, b_pad


@functools.partial(jax.jit, static_argnames=("block_b",))
def simple_model_forward(x, w_t_pad, b_pad, *, block_b=512):
    """y = x @ W^T + b, padded to lane-dense shapes, tiled over batch."""
    B, K = x.shape
    k_pad, n_pad = w_t_pad.shape

    # Batch tile: multiple of the sublane width, capped so a (TB, 128) f32
    # block stays tiny relative to VMEM on every generation (incl. v7x 64 MiB).
    tb = min(block_b, _round_up(B, SUBLANE))
    b_padded = _round_up(B, tb)

    # Zero-pad activations: batch -> tile multiple, features -> 128 lanes.
    # Zero rows/cols contribute nothing to the matmul and are sliced off below.
    x_pad = jnp.zeros((b_padded, k_pad), x.dtype).at[:B, :K].set(x)

    grid = (b_padded // tb,)
    itemsize = jnp.dtype(x.dtype).itemsize
    flops = 2 * b_padded * k_pad * n_pad
    bytes_accessed = (
        x_pad.size + w_t_pad.size + b_pad.size + b_padded * n_pad
    ) * itemsize

    out = pl.pallas_call(
        linear_kernel,
        out_shape=jax.ShapeDtypeStruct((b_padded, n_pad), x.dtype),
        grid_spec=pltpu.PrefetchScalarGridSpec(
            num_scalar_prefetch=0,
            grid=grid,
            in_specs=[
                pl.BlockSpec((tb, k_pad), lambda i: (i, 0)),      # x tile
                pl.BlockSpec((k_pad, n_pad), lambda i: (0, 0)),   # W^T (resident)
                pl.BlockSpec((1, n_pad), lambda i: (0, 0)),       # bias (resident)
            ],
            out_specs=pl.BlockSpec((tb, n_pad), lambda i: (i, 0)),
        ),
        compiler_params=pltpu.CompilerParams(
            dimension_semantics=("parallel",),  # batch axis -> megacore shard on v7x
        ),
        cost_estimate=pl.CostEstimate(
            flops=flops, transcendentals=0, bytes_accessed=bytes_accessed
        ),
    )(x_pad, w_t_pad, b_pad)

    # Strip padding: back to (B, out_features).
    return out[:B, :OUT_FEATURES]


if __name__ == "__main__":
    key = jax.random.PRNGKey(0)
    k_x, k_w, k_b = jax.random.split(key, 3)

    batch = 8

    # Deterministic parameter init (mimics nn.Linear's uniform(-1/sqrt(in), 1/sqrt(in))).
    bound = 1.0 / jnp.sqrt(jnp.float32(IN_FEATURES))
    weight = jax.random.uniform(
        k_w, (OUT_FEATURES, IN_FEATURES), jnp.float32, -bound, bound
    )
    bias = jax.random.uniform(k_b, (OUT_FEATURES,), jnp.float32, -bound, bound)

    x = jax.random.normal(k_x, (batch, IN_FEATURES), jnp.float32)

    # One-time parameter prep (hoisted out of the per-call path).
    w_t_pad, b_pad = prepare_params(weight, bias)

    out = simple_model_forward(x, w_t_pad, b_pad)
    out = jax.block_until_ready(out)

    # Sanity check against plain-JAX reference of the PyTorch forward.
    ref = x @ weight.T + bias
    assert out.shape == (batch, OUT_FEATURES)
    assert jnp.allclose(out, ref, atol=1e-5, rtol=1e-5)

    print("KERNEL_OK")
</pallas_src>

<mosaic_0001>
module attributes {stable_mosaic.version = 11 : i64} {
  func.func @linear_kernel(%arg0: i32, %arg1: memref<8x128xf32, #tpu.memory_space<vmem>>, %arg2: memref<128x128xf32, #tpu.memory_space<vmem>>, %arg3: memref<1x128xf32, #tpu.memory_space<vmem>>, %arg4: memref<8x128xf32, #tpu.memory_space<vmem>>) attributes {dimension_semantics = [#tpu.dimension_semantics<parallel>], iteration_bounds = array<i64: 1>, scalar_prefetch = 0 : i64, scratch_operands = 0 : i64, tpu.core_type = #tpu.core_type<tc>, window_params = [{transform_indices = @transform_0, window_bounds = array<i64: 8, 128>}, {pipeline_mode = #tpu.pipeline_mode<synchronous>, transform_indices = @transform_1, window_bounds = array<i64: 128, 128>}, {pipeline_mode = #tpu.pipeline_mode<synchronous>, transform_indices = @transform_2, window_bounds = array<i64: 1, 128>}, {transform_indices = @transform_3, window_bounds = array<i64: 8, 128>}]} {
    %c0 = arith.constant 0 : index
    %c0_0 = arith.constant 0 : index
    %0 = vector.load %arg1[%c0, %c0_0] : memref<8x128xf32, #tpu.memory_space<vmem>>, vector<8x128xf32>
    %c0_1 = arith.constant 0 : index
    %c0_2 = arith.constant 0 : index
    %1 = vector.load %arg2[%c0_1, %c0_2] : memref<128x128xf32, #tpu.memory_space<vmem>>, vector<128x128xf32>
    %cst = arith.constant dense<0.000000e+00> : vector<8x128xf32>
    %2 = tpu.matmul %0, %1, %cst {dimension_numbers = #tpu.dot_dimension_numbers<[1], [0], [0], [1], [0, 0, 1, 1], [], []>} : vector<8x128xf32>, vector<128x128xf32>, vector<8x128xf32> -> vector<8x128xf32>
    %c0_3 = arith.constant 0 : index
    %c0_4 = arith.constant 0 : index
    %3 = vector.load %arg3[%c0_3, %c0_4] : memref<1x128xf32, #tpu.memory_space<vmem>>, vector<1x128xf32>
    %4 = vector.broadcast %3 : vector<1x128xf32> to vector<8x128xf32>
    %5 = arith.addf %2, %4 : vector<8x128xf32>
    %c0_5 = arith.constant 0 : index
    %c0_6 = arith.constant 0 : index
    %6 = vector.load %arg4[%c0_5, %c0_6] : memref<8x128xf32, #tpu.memory_space<vmem>>, vector<8x128xf32>
    tpu.vector_store %arg4[%c0_5, %c0_6], %5 {strides = array<i32>} : memref<8x128xf32, #tpu.memory_space<vmem>>, vector<8x128xf32>,
    return
  }
  func.func @transform_0(%arg0: i32) -> (i32, i32) {
    %c0_i32 = arith.constant 0 : i32
    %c0_i32_0 = arith.constant 0 : i32
    return %arg0, %c0_i32 : i32, i32
  }
  func.func @transform_1(%arg0: i32) -> (i32, i32) {
    %c0_i32 = arith.constant 0 : i32
    %c0_i32_0 = arith.constant 0 : i32
    %c0_i32_1 = arith.constant 0 : i32
    return %c0_i32, %c0_i32_0 : i32, i32
  }
  func.func @transform_2(%arg0: i32) -> (i32, i32) {
    %c0_i32 = arith.constant 0 : i32
    %c0_i32_0 = arith.constant 0 : i32
    %c0_i32_1 = arith.constant 0 : i32
    return %c0_i32, %c0_i32_0 : i32, i32
  }
  func.func @transform_3(%arg0: i32) -> (i32, i32) {
    %c0_i32 = arith.constant 0 : i32
    %c0_i32_0 = arith.constant 0 : i32
    return %arg0, %c0_i32 : i32, i32
  }
}

</mosaic_0001>

<bundles_post_ra>
// kernel: simple_model_forward.1
= control target key start
LH: loop header
LB: loop body
LE: loop exit
PB: predicated region body
PF: predicated region fallthrough
CT: control target
= control target key end

     0   :  { %8 = vsyncpa [#allocation3], 0  ;;  %s280_s0 = inlined_call_operand.vmem [shape: f32[8,128], index: 0, kind: input, shape index: {}]   ;;  %s281_s1 = inlined_call_operand.hbm [shape: f32[128,128], index: 1, kind: input, shape index: {}]   ;;  %s282_s2 = inlined_call_operand.vmem [shape: f32[1,128], index: 2, kind: input, shape index: {}]   ;;  %s283_s3 = inlined_call_operand.hbm [shape: f32[8,128], index: 3, kind: output, shape index: {}]  }
   0x1   :  { %9 = vsyncpa [#allocation4], 0  ;;  %s242_s12 = smov [#allocation2]  }
   0x2   :  { %s17_s13 = sshll.u32 %s242_s12, 4  ;;  %s18_s13 = int_to_ptr.vmem [resolvable:$true] %s17_s13 }
   0x3   :  { %s206_s14 = scalar_lea.vmem %s18_s13, 2048  ;;  %p211_p1 = scmp.lt.s32.totalorder %s18_s13, %s18_s13 }
   0x4   :  { %p207_p0 = scmp.ne.s32.totalorder %s18_s13, %s206_s14  ;;  %p212_p2 = scmp.lt.s32.totalorder %s206_s14, %s206_s14 }
   0x6   :  { %p213_p3 = por %p212_p2, %p211_p1 }
   0x8   :  { %p214_p4 = pnand %p213_p3, %p207_p0 }
   0xa   :  { %217 = shalt.err (!%p214_p4)
}
   0xb   :  { %s243_s15 = smov 128   ;;  %s244_s16 = smov 8  }
   0xc   :  { %23 = dma.hbm_to_vmem [thread:$0]  %s281_s1, 2048, %s18_s13, [#allocation3], %s243_s15, %s243_s15, %s244_s16  }
   0xd   :  { %238 = dma.done.wait [#allocation3], 2048  }
   0xe   :  { %239 = vsyncadd [#allocation3], 4294965248  ;;  %v245_v0 = vmov 0.0   ;;  %vm246_vm0 = vmmov 0   ;;  %v45_v1 = vld [vmem:[#allocation2 + $0x78] sm:$0xff]  ;;  %v44_v2 = vld [vmem:[#allocation2 + $0x70] sm:$0xff] }
   0xf   :  { %157 = vmatprep.subr.mxu0 %v245_v0  ;;  %189 = vmatprep.mubr.msk.f32.mxu0 %vm246_vm0, %v245_v0  ;;  %v43_v3 = vld [vmem:[#allocation2 + $0x68] sm:$0xff]  ;;  %v42_v4 = vld [vmem:[#allocation2 + $0x60] sm:$0xff]  ;;  %v41_v5 = vld [vmem:[#allocation2 + $0x58] sm:$0xff]  ;;  %s247_s22 = smov [#allocation5]  }
  0x10   :  { %158 = vmatpush3.msra.mxu0 %v45_v1  ;;  %v40_v6 = vld [vmem:[#allocation2 + $0x50] sm:$0xff]  ;;  %v39_v7 = vld [vmem:[#allocation2 + $0x48] sm:$0xff]  ;;  %v38_v8 = vld [vmem:[#allocation2 + $0x40] sm:$0xff]  ;;  %s130_s23 = sshll.u32 %s247_s22, 4  ;;  %s131_s23 = int_to_ptr.vmem [resolvable:$true] %s130_s23 }
  0x11   :  { %159 = vmatprep.subr.mxu0 %v245_v0  ;;  %v37_v9 = vld [vmem:[#allocation2 + $0x38] sm:$0xff]  ;;  %v36_v10 = vld [vmem:[#allocation2 + $0x30] sm:$0xff]  ;;  %v35_v11 = vld [vmem:[#allocation2 + $0x28] sm:$0xff]  ;;  %s218_s24 = scalar_lea.vmem %s131_s23, 128  ;;  %p223_p6 = scmp.lt.s32.totalorder %s131_s23, %s131_s23 }
  0x12   :  { %160 = vmatpush3.msra.mxu0 %v44_v2  ;;  %v34_v12 = vld [vmem:[#allocation2 + $0x20] sm:$0xff]  ;;  %v33_v13 = vld [vmem:[#allocation2 + $0x18] sm:$0xff]  ;;  %v32_v14 = vld [vmem:[#allocation2 + $0x10] sm:$0xff]  ;;  %p219_p5 = scmp.ne.s32.totalorder %s131_s23, %s218_s24  ;;  %p224_p7 = scmp.lt.s32.totalorder %s218_s24, %s218_s24 }
  0x13   :  { %161 = vmatprep.subr.mxu0 %v245_v0  ;;  %v31_v15 = vld [vmem:[#allocation2 + $0x8] sm:$0xff]  ;;  %v30_v16 = vld [vmem:[#allocation2] sm:$0xff] }
  0x14   :  { %162 = vmatpush3.msra.mxu0 %v43_v3  ;;  %v29_v17 = vld [vmem:[%s280_s0] sm:$0xff]  ;;  %p225_p8 = por %p224_p7, %p223_p6 }
  0x15   :  { %163 = vmatprep.subr.mxu0 %v245_v0  ;;  %v139_v18 = vld [vmem:[%s282_s2] ss:$0 sm:$0xff] }
  0x16   :  { %164 = vmatpush3.msra.mxu0 %v42_v4  ;;  %p226_p9 = pnand %p225_p8, %p219_p5 }
  0x17   :  { %165 = vmatprep.subr.mxu0 %v245_v0 }
  0x18   :  { %166 = vmatpush3.msra.mxu0 %v41_v5 }
  0x19   :  { %167 = vmatprep.subr.mxu0 %v245_v0 }
  0x1a   :  { %168 = vmatpush3.msra.mxu0 %v40_v6 }
  0x1b   :  { %169 = vmatprep.subr.mxu0 %v245_v0 }
  0x1c   :  { %170 = vmatpush3.msra.mxu0 %v39_v7 }
  0x1d   :  { %171 = vmatprep.subr.mxu0 %v245_v0 }
  0x1e   :  { %172 = vmatpush3.msra.mxu0 %v38_v8 }
  0x1f   :  { %173 = vmatprep.subr.mxu0 %v245_v0 }
  0x20   :  { %174 = vmatpush3.msra.mxu0 %v37_v9 }
  0x21   :  { %175 = vmatprep.subr.mxu0 %v245_v0 }
  0x22   :  { %176 = vmatpush3.msra.mxu0 %v36_v10 }
  0x23   :  { %177 = vmatprep.subr.mxu0 %v245_v0 }
  0x24   :  { %178 = vmatpush3.msra.mxu0 %v35_v11 }
  0x25   :  { %179 = vmatprep.subr.mxu0 %v245_v0 }
  0x26   :  { %180 = vmatpush3.msra.mxu0 %v34_v12 }
  0x27   :  { %181 = vmatprep.subr.mxu0 %v245_v0 }
  0x28   :  { %182 = vmatpush3.msra.mxu0 %v33_v13 }
  0x29   :  { %183 = vmatprep.subr.mxu0 %v245_v0 }
  0x2a   :  { %184 = vmatpush3.msra.mxu0 %v32_v14 }
  0x2b   :  { %185 = vmatprep.subr.mxu0 %v245_v0 }
  0x2c   :  { %186 = vmatpush3.msra.mxu0 %v31_v15 }
  0x2d   :  { %187 = vmatprep.subr.mxu0 %v245_v0 }
  0x2e   :  { %188 = vmatpush3.msra.mxu0 %v30_v16 }
  0x2f   :  { %190 = vmatmul.mubr.f32.vlgmr.msra.gmra.mxu0 %v29_v17 }
  0xef   :  { %v119_v19 = vpop.f32.mrf.mxu0 }
  0xf0   :  { %v120_v20 = vadd.f32 %v139_v18, %v119_v19 }
  0xf1   :  { %v191_v21 = vpop.f32.mrf.mxu0 }
  0xf2   :  { %123 = vst [vmem:[#allocation5] sm:$0xff] %v120_v20 }
  0xf3   :  { %229 = shalt.err (!%p226_p9)
}
  0xf4   :  { %133 = dma.vmem_to_hbm [thread:$0]  %s131_s23, 128, %s283_s3, [#allocation4]  }
  0xf5   :  { %240 = dma.done.wait [#allocation4], 128  }
  0xf6   :  { %241 = vsyncadd [#allocation4], 4294967168 }
  0xf7   :  { %137 = vsyncpa [#allocation3], 1 }
  0xf8   :  { %138 = vsyncpa [#allocation4], 1 }

</bundles_post_ra>
